<compile_context>
chip_gen: v5e
topology: v5e:2x2
jax: 0.10.0
libtpu: 0.0.40
codegen_flags: <defaults>
</compile_context>

<pallas_src>
import functools

import jax
import jax.numpy as jnp
from jax.experimental import pallas as pl
from jax.experimental.pallas import tpu as pltpu

LANES = 128
SUBLANES = 8
BLOCK_ROWS_MAX = 8192            # (8192, 128) f32 = 4 MiB per input block
CHUNK_ROWS = 1024                # in-kernel reduction chunk (bounds temporaries)
VMEM_LIMIT_BYTES = 40 * 1024 * 1024   # fits 24 MiB double buffers + temps; < v7x usable
SMALL_INPUT_ELEMS = 128 * 1024   # below this, pure-JAX fallback


def _detected_tensorcores() -> int:
    """Best-effort TensorCore-per-chip count; defaults to 1 on any doubt."""
    try:
        info = pltpu.get_tpu_info()
    except Exception:
        return 1
    for attr in ("num_cores", "core_count", "num_tensorcores",
                 "tensorcores_per_chip", "cores_per_chip"):
        val = getattr(info, attr, None)
        if isinstance(val, int) and not isinstance(val, bool) and val >= 1:
            return val
    return 1


def _chunk_partial_sums(old_ref, new_ref, orig_ref, row_start, nrows,
                        block_row0, valid_rows, masked):
    """Per-chunk partial sums of y1*y1 and y2*y1, reduced to (8, 128)."""
    orig = orig_ref[pl.ds(row_start, nrows), :].astype(jnp.float32)
    y1 = old_ref[pl.ds(row_start, nrows), :].astype(jnp.float32) - orig
    y2 = new_ref[pl.ds(row_start, nrows), :].astype(jnp.float32) - orig
    if masked:
        # Zero rows past the end of the flattened array.  Mask BOTH y1 and y2:
        # out-of-bounds tile rows hold stale/uninitialized data (possibly
        # NaN/Inf), and 0 * NaN = NaN would otherwise poison S21.
        rid = jax.lax.broadcasted_iota(jnp.int32, (nrows, LANES), 0)
        keep = (rid + block_row0 + row_start) < valid_rows
        y1 = jnp.where(keep, y1, 0.0)
        y2 = jnp.where(keep, y2, 0.0)
    groups = nrows // SUBLANES
    p11 = (y1 * y1).reshape(groups, SUBLANES, LANES).sum(axis=0)
    p21 = (y2 * y1).reshape(groups, SUBLANES, LANES).sum(axis=0)
    return p11, p21


def _proj_loss_kernel(old_ref, new_ref, orig_ref, out_ref, *,
                      tiles_per_split, block_rows, chunk_rows,
                      valid_rows, need_mask):
    """Accumulates per-split partial sums of y1*y1 and y2*y1 into out_ref."""
    s = pl.program_id(0)
    k = pl.program_id(1)

    @pl.when(k == 0)
    def _init():
        # Output block index is constant over k -> VMEM-resident accumulator.
        out_ref[...] = jnp.zeros_like(out_ref)

    block_row0 = (s * tiles_per_split + k) * block_rows
    num_chunks = block_rows // chunk_rows
    rem_rows = block_rows - num_chunks * chunk_rows

    def accumulate(masked):
        p11 = jnp.zeros((SUBLANES, LANES), jnp.float32)
        p21 = jnp.zeros((SUBLANES, LANES), jnp.float32)

        if num_chunks > 0:
            def body(i, carry):
                a11, a21 = carry
                start = pl.multiple_of(i * chunk_rows, chunk_rows)
                c11, c21 = _chunk_partial_sums(
                    old_ref, new_ref, orig_ref, start, chunk_rows,
                    block_row0, valid_rows, masked)
                return a11 + c11, a21 + c21
            p11, p21 = jax.lax.fori_loop(0, num_chunks, body, (p11, p21),
                                         unroll=True)
        if rem_rows > 0:
            c11, c21 = _chunk_partial_sums(
                old_ref, new_ref, orig_ref, num_chunks * chunk_rows, rem_rows,
                block_row0, valid_rows, masked)
            p11, p21 = p11 + c11, p21 + c21

        out_ref[0, 0] += p11
        out_ref[0, 1] += p21

    if need_mask:
        # Only the genuinely ragged / fully-out-of-range blocks pay for the
        # iota + selects; everything else takes the clean path.
        ragged = block_row0 + block_rows > valid_rows

        @pl.when(ragged)
        def _masked():
            accumulate(True)

        @pl.when(jnp.logical_not(ragged))
        def _clean():
            accumulate(False)
    else:
        accumulate(False)


def proj_loss(old_attack_mid, new_mid, original_mid, coeff=None, *,
              force_kernel=False, block_rows_max=BLOCK_ROWS_MAX):
    # `coeff` is accepted but unused, exactly like the PyTorch forward.
    del coeff
    n = old_attack_mid.size
    if n == 0:
        # ||y1|| == 0 -> 0/0, same as the PyTorch module.
        return jnp.full((1, 1), jnp.nan, dtype=jnp.float32)

    if n < SMALL_INPUT_ELEMS and not force_kernel:
        # Tiny tensors: pallas_call launch/pipeline overhead dominates; XLA
        # fuses this trivially.
        y1 = (old_attack_mid.astype(jnp.float32)
              - original_mid.astype(jnp.float32)).reshape(-1)
        y2 = (new_mid.astype(jnp.float32)
              - original_mid.astype(jnp.float32)).reshape(-1)
        s11 = jnp.vdot(y1, y1)
        s21 = jnp.vdot(y2, y1)
        norm = jnp.sqrt(s11)
        return ((s21 / norm) / norm).reshape(1, 1)

    block_rows_max = max(16, (int(block_rows_max) // 16) * 16)

    lane_pad = (-n) % LANES
    rows = (n + lane_pad) // LANES

    if rows >= block_rows_max:
        block_rows, row_pad = block_rows_max, 0
    else:
        # One block covering everything, rounded to a multiple of 16 so
        # bf16/int8 inputs still tile cleanly.
        row_pad = (-rows) % 16
        block_rows = rows + row_pad

    pad = lane_pad + row_pad * LANES

    def prep(x):
        x = x.reshape(-1)                       # free for contiguous arrays
        if pad:
            # Only hit when numel % 128 != 0 or the input is tiny; the common
            # big-tensor path does no extra HBM copies here.
            x = jnp.pad(x, (0, pad))
        return x.reshape(-1, LANES)             # free row-major reshape

    old2d = prep(old_attack_mid)
    new2d = prep(new_mid)
    orig2d = prep(original_mid)
    rows_p = old2d.shape[0]                     # padded zeros contribute 0

    num_blocks = (rows_p + block_rows - 1) // block_rows
    # One stream per TensorCore only when a 2-TC chip (v7x) is positively
    # detected; on single-core v5e/v6e the split just wastes duplicate DMA.
    two_cores = _detected_tensorcores() == 2
    num_splits = 2 if (two_cores and num_blocks >= 2) else 1
    tiles_per_split = (num_blocks + num_splits - 1) // num_splits
    covered_rows = num_splits * tiles_per_split * block_rows
    need_mask = covered_rows != rows_p
    last_block = num_blocks - 1
    chunk_rows = min(CHUNK_ROWS, block_rows)

    def data_index(s, k):
        # Clamp so any duplicate trailing iteration of an uneven split re-reads
        # an in-bounds block; its contribution is masked to zero in-kernel.
        return (jnp.minimum(s * tiles_per_split + k, last_block), 0)

    tile_spec = pl.BlockSpec((block_rows, LANES), data_index)

    kernel = functools.partial(
        _proj_loss_kernel,
        tiles_per_split=tiles_per_split,
        block_rows=block_rows,
        chunk_rows=chunk_rows,
        valid_rows=rows_p,
        need_mask=need_mask,
    )

    if num_splits > 1:
        # Actually shard the leading axis across the two TensorCores.
        dim_sem = (pltpu.CORE_PARALLEL, pltpu.ARBITRARY)
    else:
        dim_sem = ("parallel", "arbitrary")

    partials = pl.pallas_call(
        kernel,
        out_shape=jax.ShapeDtypeStruct((num_splits, 2, SUBLANES, LANES),
                                       jnp.float32),
        grid_spec=pltpu.PrefetchScalarGridSpec(
            num_scalar_prefetch=0,
            grid=(num_splits, tiles_per_split),
            in_specs=[tile_spec, tile_spec, tile_spec],
            out_specs=pl.BlockSpec((1, 2, SUBLANES, LANES),
                                   lambda s, k: (s, 0, 0, 0)),
        ),
        compiler_params=pltpu.CompilerParams(
            dimension_semantics=dim_sem,
            vmem_limit_bytes=VMEM_LIMIT_BYTES,
        ),
    )(old2d, new2d, orig2d)

    # Tiny epilogue: cross-lane reduction + sqrt + divides on a few KiB.
    s11 = jnp.sum(partials[:, 0])
    s21 = jnp.sum(partials[:, 1])
    norm = jnp.sqrt(s11)
    # Match PyTorch op order: (y2 . (y1/||y1||)) / ||y1||
    return ((s21 / norm) / norm).reshape(1, 1)


def _reference(old, new, orig):
    y1 = (old - orig).reshape(1, -1).astype(jnp.float32)
    y2 = (new - orig).reshape(1, -1).astype(jnp.float32)
    nrm = jnp.linalg.norm(y1)
    return (y2 @ (y1 / nrm).T) / nrm


if __name__ == "__main__":
    key = jax.random.PRNGKey(0)

    def make(shape, k):
        k1, k2, k3 = jax.random.split(k, 3)
        return (jax.random.normal(k1, shape, dtype=jnp.float32),
                jax.random.normal(k2, shape, dtype=jnp.float32),
                jax.random.normal(k3, shape, dtype=jnp.float32))

    def check(res, old, new, orig, tol=3e-5):
        res = jax.block_until_ready(res)
        assert res.shape == (1, 1)
        ref = _reference(old, new, orig)
        assert jnp.allclose(res, ref, rtol=tol, atol=tol), (res, ref)

    k0, k1, k2, key = jax.random.split(key, 4)

    # 1) Primary small example (NCHW feature map): small-input JAX fallback.
    old, new, orig = make((2, 4, 16, 16), k0)
    check(proj_loss(old, new, orig, 1.0), old, new, orig)
    # 1b) Same shape forced through the Pallas kernel (single tiny block).
    check(proj_loss(old, new, orig, 1.0, force_kernel=True), old, new, orig)

    # 2) numel not a multiple of 128: exercises the lane-pad kernel path.
    old, new, orig = make((3, 5, 7, 11), k1)
    check(proj_loss(old, new, orig, 1.0, force_kernel=True), old, new, orig)

    # 3) Medium tensor (327680 elems -> 2560 rows): small block_rows_max to
    #    exercise the multi-block grid, the ragged masked tail block, and the
    #    chunk-remainder path without huge test arrays.
    old, new, orig = make((4, 16, 64, 80), k2)
    check(proj_loss(old, new, orig, 1.0, block_rows_max=1040), old, new, orig)
    # 3b) Same tensor through the default single-big-block streaming path
    #     (chunked fori_loop with 2 full chunks + 512-row remainder).
    check(proj_loss(old, new, orig, 1.0), old, new, orig)

    print("KERNEL_OK")
</pallas_src>

<mosaic_0001>
module attributes {stable_mosaic.version = 11 : i64} {
  func.func @_proj_loss_kernel(%arg0: i32, %arg1: i32, %arg2: memref<16x128xf32, #tpu.memory_space<vmem>>, %arg3: memref<16x128xf32, #tpu.memory_space<vmem>>, %arg4: memref<16x128xf32, #tpu.memory_space<vmem>>, %arg5: memref<1x2x8x128xf32, #tpu.memory_space<vmem>>) attributes {dimension_semantics = [#tpu.dimension_semantics<parallel>, #tpu.dimension_semantics<arbitrary>], iteration_bounds = array<i64: 1, 1>, scalar_prefetch = 0 : i64, scratch_operands = 0 : i64, tpu.core_type = #tpu.core_type<tc>, window_params = [{transform_indices = @transform_0, window_bounds = array<i64: 16, 128>}, {transform_indices = @transform_1, window_bounds = array<i64: 16, 128>}, {transform_indices = @transform_2, window_bounds = array<i64: 16, 128>}, {transform_indices = @transform_3, window_bounds = array<i64: 1, 2, 8, 128>}]} {
    %c0_i32 = arith.constant 0 : i32
    %0 = arith.cmpi eq, %arg1, %c0_i32 : i32
    %1 = arith.extui %0 : i1 to i32
    %c0_i32_0 = arith.constant 0 : i32
    %2 = arith.cmpi ne, %1, %c0_i32_0 : i32
    scf.if %2 {
      %cst_22 = arith.constant 0.000000e+00 : f32
      %35 = vector.broadcast %cst_22 : f32 to vector<1x2x8x128xf32>
      %c0_23 = arith.constant 0 : index
      %c0_24 = arith.constant 0 : index
      %c0_25 = arith.constant 0 : index
      %c0_26 = arith.constant 0 : index
      %36 = vector.load %arg5[%c0_23, %c0_24, %c0_25, %c0_26] : memref<1x2x8x128xf32, #tpu.memory_space<vmem>>, vector<1x2x8x128xf32>
      tpu.vector_store %arg5[%c0_23, %c0_24, %c0_25, %c0_26], %35 {strides = array<i32>} : memref<1x2x8x128xf32, #tpu.memory_space<vmem>>, vector<1x2x8x128xf32>,
    } else {
    }
    %cst = arith.constant 0.000000e+00 : f32
    %3 = vector.broadcast %cst : f32 to vector<8x128xf32>
    %cst_1 = arith.constant 0.000000e+00 : f32
    %4 = vector.broadcast %cst_1 : f32 to vector<8x128xf32>
    %c0_i32_2 = arith.constant 0 : i32
    %c16_i32 = arith.constant 16 : i32
    %5 = arith.muli %c0_i32_2, %c16_i32 : i32
    %6 = tpu.assume_multiple %5, 16 : i32
    %7 = arith.index_cast %6 : i32 to index
    %c0 = arith.constant 0 : index
    %8 = vector.load %arg4[%7, %c0] : memref<16x128xf32, #tpu.memory_space<vmem>>, vector<16x128xf32>
    %9 = arith.index_cast %6 : i32 to index
    %c0_3 = arith.constant 0 : index
    %10 = vector.load %arg2[%9, %c0_3] : memref<16x128xf32, #tpu.memory_space<vmem>>, vector<16x128xf32>
    %11 = arith.subf %10, %8 : vector<16x128xf32>
    %12 = arith.index_cast %6 : i32 to index
    %c0_4 = arith.constant 0 : index
    %13 = vector.load %arg3[%12, %c0_4] : memref<16x128xf32, #tpu.memory_space<vmem>>, vector<16x128xf32>
    %14 = arith.subf %13, %8 : vector<16x128xf32>
    %15 = arith.mulf %11, %11 : vector<16x128xf32>
    %16 = vector.shape_cast %15 : vector<16x128xf32> to vector<2x8x128xf32>
    %cst_5 = arith.constant dense<0.000000e+00> : vector<8x128xf32>
    %17 = vector.multi_reduction <add>, %16, %cst_5 [0] : vector<2x8x128xf32> to vector<8x128xf32>
    %18 = arith.mulf %14, %11 : vector<16x128xf32>
    %19 = vector.shape_cast %18 : vector<16x128xf32> to vector<2x8x128xf32>
    %cst_6 = arith.constant dense<0.000000e+00> : vector<8x128xf32>
    %20 = vector.multi_reduction <add>, %19, %cst_6 [0] : vector<2x8x128xf32> to vector<8x128xf32>
    %21 = arith.addf %3, %17 : vector<8x128xf32>
    %22 = arith.addf %4, %20 : vector<8x128xf32>
    %c1_i32 = arith.constant 1 : i32
    %c0_7 = arith.constant 0 : index
    %c0_8 = arith.constant 0 : index
    %c0_9 = arith.constant 0 : index
    %c0_10 = arith.constant 0 : index
    %23 = vector.load %arg5[%c0_7, %c0_8, %c0_9, %c0_10] : memref<1x2x8x128xf32, #tpu.memory_space<vmem>>, vector<1x1x8x128xf32>
    %24 = vector.shape_cast %23 : vector<1x1x8x128xf32> to vector<8x128xf32>
    %25 = arith.addf %24, %21 : vector<8x128xf32>
    %c0_11 = arith.constant 0 : index
    %c0_12 = arith.constant 0 : index
    %c0_13 = arith.constant 0 : index
    %c0_14 = arith.constant 0 : index
    %26 = vector.load %arg5[%c0_11, %c0_12, %c0_13, %c0_14] : memref<1x2x8x128xf32, #tpu.memory_space<vmem>>, vector<1x1x8x128xf32>
    %27 = vector.shape_cast %26 : vector<1x1x8x128xf32> to vector<8x128xf32>
    %28 = vector.shape_cast %25 : vector<8x128xf32> to vector<1x1x8x128xf32>
    tpu.vector_store %arg5[%c0_11, %c0_12, %c0_13, %c0_14], %28 {strides = array<i32>} : memref<1x2x8x128xf32, #tpu.memory_space<vmem>>, vector<1x1x8x128xf32>,
    %c0_15 = arith.constant 0 : index
    %c1 = arith.constant 1 : index
    %c0_16 = arith.constant 0 : index
    %c0_17 = arith.constant 0 : index
    %29 = vector.load %arg5[%c0_15, %c1, %c0_16, %c0_17] : memref<1x2x8x128xf32, #tpu.memory_space<vmem>>, vector<1x1x8x128xf32>
    %30 = vector.shape_cast %29 : vector<1x1x8x128xf32> to vector<8x128xf32>
    %31 = arith.addf %30, %22 : vector<8x128xf32>
    %c0_18 = arith.constant 0 : index
    %c1_19 = arith.constant 1 : index
    %c0_20 = arith.constant 0 : index
    %c0_21 = arith.constant 0 : index
    %32 = vector.load %arg5[%c0_18, %c1_19, %c0_20, %c0_21] : memref<1x2x8x128xf32, #tpu.memory_space<vmem>>, vector<1x1x8x128xf32>
    %33 = vector.shape_cast %32 : vector<1x1x8x128xf32> to vector<8x128xf32>
    %34 = vector.shape_cast %31 : vector<8x128xf32> to vector<1x1x8x128xf32>
    tpu.vector_store %arg5[%c0_18, %c1_19, %c0_20, %c0_21], %34 {strides = array<i32>} : memref<1x2x8x128xf32, #tpu.memory_space<vmem>>, vector<1x1x8x128xf32>,
    return
  }
  func.func @transform_0(%arg0: i32, %arg1: i32) -> (i32, i32) {
    %c1_i32 = arith.constant 1 : i32
    %0 = arith.muli %arg0, %c1_i32 : i32
    %1 = arith.addi %0, %arg1 : i32
    %c0_i32 = arith.constant 0 : i32
    %2 = arith.minsi %1, %c0_i32 : i32
    %c0_i32_0 = arith.constant 0 : i32
    %c0_i32_1 = arith.constant 0 : i32
    return %2, %c0_i32_0 : i32, i32
  }
  func.func @transform_1(%arg0: i32, %arg1: i32) -> (i32, i32) {
    %c1_i32 = arith.constant 1 : i32
    %0 = arith.muli %arg0, %c1_i32 : i32
    %1 = arith.addi %0, %arg1 : i32
    %c0_i32 = arith.constant 0 : i32
    %2 = arith.minsi %1, %c0_i32 : i32
    %c0_i32_0 = arith.constant 0 : i32
    %c0_i32_1 = arith.constant 0 : i32
    return %2, %c0_i32_0 : i32, i32
  }
  func.func @transform_2(%arg0: i32, %arg1: i32) -> (i32, i32) {
    %c1_i32 = arith.constant 1 : i32
    %0 = arith.muli %arg0, %c1_i32 : i32
    %1 = arith.addi %0, %arg1 : i32
    %c0_i32 = arith.constant 0 : i32
    %2 = arith.minsi %1, %c0_i32 : i32
    %c0_i32_0 = arith.constant 0 : i32
    %c0_i32_1 = arith.constant 0 : i32
    return %2, %c0_i32_0 : i32, i32
  }
  func.func @transform_3(%arg0: i32, %arg1: i32) -> (i32, i32, i32, i32) {
    %c0_i32 = arith.constant 0 : i32
    %c0_i32_0 = arith.constant 0 : i32
    %c0_i32_1 = arith.constant 0 : i32
    %c0_i32_2 = arith.constant 0 : i32
    return %arg0, %c0_i32, %c0_i32_0, %c0_i32_1 : i32, i32, i32, i32
  }
}

</mosaic_0001>

<bundles_post_ra>
// kernel: tpu_custom_call.1
= control target key start
LH: loop header
LB: loop body
LE: loop exit
PB: predicated region body
PF: predicated region fallthrough
CT: control target
= control target key end

     0   :  { %8 = vsyncpa [#allocation3], 0  ;;  %s308_s0 = inlined_call_operand.hbm [shape: f32[16,128], index: 0, kind: input, shape index: {}]   ;;  %s309_s1 = inlined_call_operand.hbm [shape: f32[16,128], index: 1, kind: input, shape index: {}]   ;;  %s310_s2 = inlined_call_operand.hbm [shape: f32[16,128], index: 2, kind: input, shape index: {}]   ;;  %s311_s3 = inlined_call_operand.hbm [shape: f32[1,2,8,128], index: 3, kind: output, shape index: {}]  }
   0x1   :  { %9 = vsyncpa [#allocation6], 0 }
   0x2   :  { %10 = vsyncpa [#allocation4], 0  ;;  %s40_s14 = sshll.u32 %s309_s1, 4  ;;  %s258_s15 = smov [#allocation5]   ;;  %s41_s14 = int_to_ptr.hbm [resolvable:$true] %s40_s14 }
   0x3   :  { %s42_s16 = sshll.u32 %s258_s15, 4  ;;  %s21_s19 = sshll.u32 %s308_s0, 4  ;;  %s43_s16 = int_to_ptr.vmem [resolvable:$true] %s42_s16  ;;  %s22_s19 = int_to_ptr.hbm [resolvable:$true] %s21_s19 }
   0x4   :  { %s259_s20 = smov 128   ;;  %s260_s21 = smov 8  }
   0x5   :  { %48 = dma.hbm_to_vmem [thread:$0]  %s41_s14, 256, %s43_s16, [#allocation6], %s259_s20, %s259_s20, %s260_s21  }
   0x6   :  { %s261_s22 = smov [#allocation2]   ;;  %s59_s1 = sshll.u32 %s310_s2, 4  ;;  %s60_s1 = int_to_ptr.hbm [resolvable:$true] %s59_s1 }
   0x7   :  { %s23_s23 = sshll.u32 %s261_s22, 4  ;;  %s262_s0 = smov [#allocation7]   ;;  %s24_s23 = int_to_ptr.vmem [resolvable:$true] %s23_s23 }
   0x8   :  { %29 = dma.hbm_to_vmem [thread:$0]  %s22_s19, 256, %s24_s23, [#allocation3], %s259_s20, %s259_s20, %s260_s21  }
   0x9   :  { %s61_s26 = sshll.u32 %s262_s0, 4  ;;  %s62_s26 = int_to_ptr.vmem [resolvable:$true] %s61_s26 }
   0xa   :  { %67 = dma.hbm_to_vmem [thread:$0]  %s60_s1, 256, %s62_s26, [#allocation6], %s259_s20, %s259_s20, %s260_s21  }
   0xb   :  { %252 = dma.done.wait [#allocation3], 256  }
   0xc   :  { %253 = vsyncadd [#allocation3], 4294967040 }
   0xd   :  { %254 = dma.done.wait [#allocation6], 512  }
   0xe   :  { %255 = vsyncadd [#allocation6], 4294966784  ;;  %v98_v0 = vld [vmem:[#allocation7] sm:$0xff]  ;;  %v99_v1 = vld [vmem:[#allocation7 + $0x8] sm:$0xff]  ;;  %s263_s2 = smov [#allocation8]   ;;  %s129_s30 = sshll.u32 %s311_s3, 4  ;;  %s130_s30 = int_to_ptr.hbm [resolvable:$true] %s129_s30 }
   0xf   :  { %v100_v2 = vld [vmem:[#allocation2] sm:$0xff]  ;;  %v101_v3 = vld [vmem:[#allocation2 + $0x8] sm:$0xff]  ;;  %v104_v5 = vld [vmem:[#allocation5] sm:$0xff]  ;;  %s127_s27 = sshll.u32 %s263_s2, 4  ;;  %s128_s27 = int_to_ptr.vmem [resolvable:$true] %s127_s27 }
  0x10   :  { %v102_v4 = vsub.f32 %v100_v2, %v98_v0  ;;  %v105_v6 = vld [vmem:[#allocation5 + $0x8] sm:$0xff]  ;;  %v103_v7 = vsub.f32 %v101_v3, %v99_v1  ;;  %v106_v8 = vsub.f32 %v104_v5, %v98_v0 }
  0x11   :  { %v107_v9 = vsub.f32 %v105_v6, %v99_v1 }
  0x12   :  { %v108_v10 = vmul.f32 %v102_v4, %v102_v4  ;;  %v109_v11 = vmul.f32 %v103_v7, %v103_v7  ;;  %v111_v12 = vmul.f32 %v106_v8, %v102_v4 }
  0x13   :  { %v112_v13 = vmul.f32 %v107_v9, %v103_v7 }
  0x14   :  { %v110_v14 = vadd.f32 %v109_v11, %v108_v10 }
  0x15   :  { %v113_v15 = vadd.f32 %v112_v13, %v111_v12 }
  0x16   :  { %118 = vst [vmem:[#allocation8] sm:$0xff] %v110_v14 }
  0x17   :  { %122 = vst [vmem:[#allocation8 + $0x8] sm:$0xff] %v113_v15 }
  0x18   :  { %135 = dma.vmem_to_hbm [thread:$0]  %s128_s27, 256, %s130_s30, [#allocation4], %s259_s20, %s259_s20, %s260_s21  }
  0x19   :  { %256 = dma.done.wait [#allocation4], 256  }
  0x1a   :  { %257 = vsyncadd [#allocation4], 4294967040 }
  0x1b   :  { %140 = vsyncpa [#allocation3], 1 }
  0x1c   :  { %141 = vsyncpa [#allocation6], 1 }
  0x1d   :  { %142 = vsyncpa [#allocation4], 1 }

</bundles_post_ra>
